<compile_context>
chip_gen: v7x
topology: tpu7x:2x2x1
jax: 0.10.0
libtpu: 0.0.40
codegen_flags: <defaults>
</compile_context>

<pallas_src>
import jax
import jax.numpy as jnp
from jax.experimental import pallas as pl
from jax.experimental.pallas import tpu as pltpu

N_IN = 13
LAYERS = [40, 20, 10, 10, 10]               # hidden widths; output width is 1
DIMS = [N_IN] + LAYERS + [1]
N_LAYERS = len(DIMS) - 1                    # 6 linear layers
N_IN_PAD = 16                               # first-layer contraction dim (13 -> 16)
PAD = 128                                   # padded width of every hidden layer
W_ROWS = N_LAYERS * PAD                     # 768 rows in the packed W^T slab
OUT_SCALE = 2000.0                          # folded into the last layer at pack time

MAX_BM = 2048                               # batch-tile cap (VMEM stays << limit)
SPLIT_MIN_ROWS = 512                        # >= 2 tiles once the (128-rounded) batch
                                            # reaches this, so v7x uses both TCs


def _cdiv(a, b):
    return -(-a // b)


def _round_up(n, m):
    return _cdiv(n, m) * m


def _mlp_kernel(xT_ref, w_ref, b_ref, o_ref):
    # Layer 0: W0^T (128, 16) @ x^T (16, BM) -> (128, BM).  Padded weight
    # rows/cols and padded feature rows are zero, so padded sublanes stay
    # exactly zero through every layer.
    h = jnp.dot(w_ref[0:PAD, 0:N_IN_PAD], xT_ref[...],
                preferred_element_type=jnp.float32)
    h = jnp.maximum(h + b_ref[:, 0:1], 0.0)

    # Layers 1..4 (Linear + ReLU) and layer 5 (Linear only).  Dropout == id.
    for k in range(1, N_LAYERS):
        r = k * PAD
        h = jnp.dot(w_ref[r:r + PAD, :], h,
                    preferred_element_type=jnp.float32) + b_ref[:, k:k + 1]
        if k < N_LAYERS - 1:
            h = jnp.maximum(h, 0.0)

    # Row 0 carries the 1-wide output; *2000 is already folded into W5 / b5.
    o_ref[...] = h[0:1, :]


def init_params(key):
    """Deterministic init. Weights stored (in, out); PyTorch-style U(-k, k)."""
    params = []
    for i in range(N_LAYERS):
        fan_in, fan_out = DIMS[i], DIMS[i + 1]
        key, kw, kb = jax.random.split(key, 3)
        bound = 1.0 / jnp.sqrt(fan_in)
        w = jax.random.uniform(kw, (fan_in, fan_out), jnp.float32, -bound, bound)
        b = jax.random.uniform(kb, (fan_out,), jnp.float32, -bound, bound)
        params.append((w, b))
    return params


def pack_params(params):
    """Pack the 6 transposed, zero-padded weights into one (768, 128) slab and
    the 6 biases into one (128, 128) slab (column k = bias_k as a column
    vector).  The final *2000 output scale is folded into layer 5 here.
    Done once at model setup."""
    w_slab = jnp.zeros((W_ROWS, PAD), jnp.float32)
    b_slab = jnp.zeros((PAD, PAD), jnp.float32)
    for k, (w, b) in enumerate(params):
        scale = OUT_SCALE if k == N_LAYERS - 1 else 1.0
        wt = (w.T.astype(jnp.float32)) * scale          # (out_k, in_k)
        w_slab = w_slab.at[k * PAD:k * PAD + wt.shape[0], :wt.shape[1]].set(wt)
        b_slab = b_slab.at[:b.shape[0], k].set(b.astype(jnp.float32) * scale)
    return w_slab, b_slab


def _pick_tiling(B):
    """Static (trace-time) batch tiling: lane-aligned tiles, minimal padding,
    >= 2 tiles for large batches so v7x's 2 TensorCores both run."""
    B128 = _round_up(B, 128)
    n_tiles = _cdiv(B128, MAX_BM)
    if B128 >= SPLIT_MIN_ROWS:
        n_tiles = max(n_tiles, 2)
    BM = _round_up(_cdiv(B128, n_tiles), 128)
    n_tiles = _cdiv(B128, BM)
    B_pad = n_tiles * BM
    return BM, B_pad, n_tiles


@jax.jit
def obj_surrogate_forward(packed, bsw, gor, z_c, z_gl, q_gl_max):
    w_slab, b_slab = packed
    B = bsw.shape[0]

    # Feature prep identical to the PyTorch forward's hstack; pure glue that
    # XLA fuses under jit (the transpose is part of the same fusion).
    x = jnp.concatenate(
        [z_c, z_gl, bsw[:, None], gor[:, None] / 1000.0,
         (q_gl_max[:, None] - 100000.0) / 200000.0], axis=1
    ).astype(jnp.float32)
    assert x.shape[1] == N_IN

    BM, B_pad, n_tiles = _pick_tiling(B)

    # (B, 13) -> (16, B_pad): feature-major so both kernel I/O tiles are
    # lane-dense along the batch axis.
    xT = jnp.pad(x.T, ((0, N_IN_PAD - N_IN), (0, B_pad - B)))

    cost = pl.CostEstimate(
        flops=2 * B_pad * (N_IN_PAD * PAD + (N_LAYERS - 1) * PAD * PAD),
        transcendentals=0,
        bytes_accessed=4 * (N_IN_PAD * B_pad + W_ROWS * PAD + PAD * PAD + B_pad),
    )

    out = pl.pallas_call(
        _mlp_kernel,
        out_shape=jax.ShapeDtypeStruct((1, B_pad), jnp.float32),
        grid_spec=pltpu.PrefetchScalarGridSpec(
            num_scalar_prefetch=0,
            grid=(n_tiles,),
            in_specs=[
                # x^T tile: lane-dense (16, BM)
                pl.BlockSpec((N_IN_PAD, BM), lambda i: (0, i)),
                # resident packed W^T slab (constant index_map, single buffer)
                pl.BlockSpec((W_ROWS, PAD), lambda i: (0, 0),
                             pipeline_mode=pl.Buffered(1)),
                # resident packed bias slab
                pl.BlockSpec((PAD, PAD), lambda i: (0, 0),
                             pipeline_mode=pl.Buffered(1)),
            ],
            out_specs=pl.BlockSpec((1, BM), lambda i: (0, i)),
        ),
        compiler_params=pltpu.CompilerParams(
            dimension_semantics=("parallel",)),
        cost_estimate=cost,
    )(xT, w_slab, b_slab)

    return out[0, :B][:, None]                                  # (B, 1)


def _reference(params, bsw, gor, z_c, z_gl, q_gl_max):
    x = jnp.concatenate(
        [z_c, z_gl, bsw[:, None], gor[:, None] / 1000.0,
         (q_gl_max[:, None] - 100000.0) / 200000.0], axis=1
    ).astype(jnp.float32)
    h = x
    for i, (w, b) in enumerate(params):
        h = h @ w + b
        if i < len(params) - 1:
            h = jnp.maximum(h, 0.0)
    return h * 2000.0


if __name__ == "__main__":
    key = jax.random.PRNGKey(0)
    kp, *ks = jax.random.split(key, 16)

    params = init_params(kp)
    packed = pack_params(params)      # one-time weight/bias packing

    def make_inputs(B, keys):
        k1, k2, k3, k4, k5 = keys
        z_c = jax.random.uniform(k1, (B, 5), jnp.float32)
        z_gl = jax.random.uniform(k2, (B, 5), jnp.float32)
        bsw = jax.random.uniform(k3, (B,), jnp.float32)
        gor = jax.random.uniform(k4, (B,), jnp.float32, 0.0, 2000.0)
        q_gl_max = jax.random.uniform(k5, (B,), jnp.float32, 50000.0, 300000.0)
        return bsw, gor, z_c, z_gl, q_gl_max

    # B=8   : single 128-wide tile (tiny-batch path).
    # B=300 : single 384-wide tile (adaptive tile -> only 84 padded rows).
    # B=1000: two 512-wide tiles (multi-tile grid; megacore-parallel on v7x).
    test_batches = [(8, ks[0:5]), (300, ks[5:10]), (1000, ks[10:15])]
    for B, keys in test_batches:
        args = make_inputs(B, keys)
        y = jax.block_until_ready(obj_surrogate_forward(packed, *args))
        y_ref = _reference(params, *args)
        assert y.shape == (B, 1)
        assert jnp.allclose(y, y_ref, rtol=1e-4, atol=1e-2), (B, y, y_ref)

    print("KERNEL_OK")
</pallas_src>

<mosaic_0001>
module attributes {stable_mosaic.version = 11 : i64} {
  func.func @_mlp_kernel(%arg0: i32, %arg1: memref<16x128xf32, #tpu.memory_space<vmem>>, %arg2: memref<768x128xf32, #tpu.memory_space<vmem>>, %arg3: memref<128x128xf32, #tpu.memory_space<vmem>>, %arg4: memref<1x128xf32, #tpu.memory_space<vmem>>) attributes {dimension_semantics = [#tpu.dimension_semantics<parallel>], iteration_bounds = array<i64: 1>, scalar_prefetch = 0 : i64, scratch_operands = 0 : i64, tpu.core_type = #tpu.core_type<tc>, window_params = [{transform_indices = @transform_0, window_bounds = array<i64: 16, 128>}, {pipeline_mode = #tpu.pipeline_mode<synchronous>, transform_indices = @transform_1, window_bounds = array<i64: 768, 128>}, {pipeline_mode = #tpu.pipeline_mode<synchronous>, transform_indices = @transform_2, window_bounds = array<i64: 128, 128>}, {transform_indices = @transform_3, window_bounds = array<i64: 1, 128>}]} {
    %c0 = arith.constant 0 : index
    %c0_0 = arith.constant 0 : index
    %0 = vector.load %arg2[%c0, %c0_0] : memref<768x128xf32, #tpu.memory_space<vmem>>, vector<128x16xf32>
    %c0_1 = arith.constant 0 : index
    %c0_2 = arith.constant 0 : index
    %1 = vector.load %arg1[%c0_1, %c0_2] : memref<16x128xf32, #tpu.memory_space<vmem>>, vector<16x128xf32>
    %cst = arith.constant dense<0.000000e+00> : vector<128x128xf32>
    %2 = tpu.matmul %0, %1, %cst {dimension_numbers = #tpu.dot_dimension_numbers<[1], [0], [0], [1], [0, 0, 1, 1], [], []>} : vector<128x16xf32>, vector<16x128xf32>, vector<128x128xf32> -> vector<128x128xf32>
    %c0_3 = arith.constant 0 : index
    %c0_4 = arith.constant 0 : index
    %3 = vector.load %arg3[%c0_3, %c0_4] : memref<128x128xf32, #tpu.memory_space<vmem>>, vector<128x1xf32>
    %4 = vector.broadcast %3 : vector<128x1xf32> to vector<128x128xf32>
    %5 = arith.addf %2, %4 : vector<128x128xf32>
    %cst_5 = arith.constant 0.000000e+00 : f32
    %6 = vector.broadcast %cst_5 : f32 to vector<128x128xf32>
    %7 = arith.maximumf %5, %6 : vector<128x128xf32>
    %c128 = arith.constant 128 : index
    %c0_6 = arith.constant 0 : index
    %8 = vector.load %arg2[%c128, %c0_6] : memref<768x128xf32, #tpu.memory_space<vmem>>, vector<128x128xf32>
    %cst_7 = arith.constant dense<0.000000e+00> : vector<128x128xf32>
    %9 = tpu.matmul %8, %7, %cst_7 {dimension_numbers = #tpu.dot_dimension_numbers<[1], [0], [0], [1], [0, 0, 1, 1], [], []>} : vector<128x128xf32>, vector<128x128xf32>, vector<128x128xf32> -> vector<128x128xf32>
    %c0_8 = arith.constant 0 : index
    %c1 = arith.constant 1 : index
    %10 = vector.load %arg3[%c0_8, %c1] : memref<128x128xf32, #tpu.memory_space<vmem>>, vector<128x1xf32>
    %11 = vector.broadcast %10 : vector<128x1xf32> to vector<128x128xf32>
    %12 = arith.addf %9, %11 : vector<128x128xf32>
    %cst_9 = arith.constant 0.000000e+00 : f32
    %13 = vector.broadcast %cst_9 : f32 to vector<128x128xf32>
    %14 = arith.maximumf %12, %13 : vector<128x128xf32>
    %c256 = arith.constant 256 : index
    %c0_10 = arith.constant 0 : index
    %15 = vector.load %arg2[%c256, %c0_10] : memref<768x128xf32, #tpu.memory_space<vmem>>, vector<128x128xf32>
    %cst_11 = arith.constant dense<0.000000e+00> : vector<128x128xf32>
    %16 = tpu.matmul %15, %14, %cst_11 {dimension_numbers = #tpu.dot_dimension_numbers<[1], [0], [0], [1], [0, 0, 1, 1], [], []>} : vector<128x128xf32>, vector<128x128xf32>, vector<128x128xf32> -> vector<128x128xf32>
    %c0_12 = arith.constant 0 : index
    %c2 = arith.constant 2 : index
    %17 = vector.load %arg3[%c0_12, %c2] : memref<128x128xf32, #tpu.memory_space<vmem>>, vector<128x1xf32>
    %18 = vector.broadcast %17 : vector<128x1xf32> to vector<128x128xf32>
    %19 = arith.addf %16, %18 : vector<128x128xf32>
    %cst_13 = arith.constant 0.000000e+00 : f32
    %20 = vector.broadcast %cst_13 : f32 to vector<128x128xf32>
    %21 = arith.maximumf %19, %20 : vector<128x128xf32>
    %c384 = arith.constant 384 : index
    %c0_14 = arith.constant 0 : index
    %22 = vector.load %arg2[%c384, %c0_14] : memref<768x128xf32, #tpu.memory_space<vmem>>, vector<128x128xf32>
    %cst_15 = arith.constant dense<0.000000e+00> : vector<128x128xf32>
    %23 = tpu.matmul %22, %21, %cst_15 {dimension_numbers = #tpu.dot_dimension_numbers<[1], [0], [0], [1], [0, 0, 1, 1], [], []>} : vector<128x128xf32>, vector<128x128xf32>, vector<128x128xf32> -> vector<128x128xf32>
    %c0_16 = arith.constant 0 : index
    %c3 = arith.constant 3 : index
    %24 = vector.load %arg3[%c0_16, %c3] : memref<128x128xf32, #tpu.memory_space<vmem>>, vector<128x1xf32>
    %25 = vector.broadcast %24 : vector<128x1xf32> to vector<128x128xf32>
    %26 = arith.addf %23, %25 : vector<128x128xf32>
    %cst_17 = arith.constant 0.000000e+00 : f32
    %27 = vector.broadcast %cst_17 : f32 to vector<128x128xf32>
    %28 = arith.maximumf %26, %27 : vector<128x128xf32>
    %c512 = arith.constant 512 : index
    %c0_18 = arith.constant 0 : index
    %29 = vector.load %arg2[%c512, %c0_18] : memref<768x128xf32, #tpu.memory_space<vmem>>, vector<128x128xf32>
    %cst_19 = arith.constant dense<0.000000e+00> : vector<128x128xf32>
    %30 = tpu.matmul %29, %28, %cst_19 {dimension_numbers = #tpu.dot_dimension_numbers<[1], [0], [0], [1], [0, 0, 1, 1], [], []>} : vector<128x128xf32>, vector<128x128xf32>, vector<128x128xf32> -> vector<128x128xf32>
    %c0_20 = arith.constant 0 : index
    %c4 = arith.constant 4 : index
    %31 = vector.load %arg3[%c0_20, %c4] : memref<128x128xf32, #tpu.memory_space<vmem>>, vector<128x1xf32>
    %32 = vector.broadcast %31 : vector<128x1xf32> to vector<128x128xf32>
    %33 = arith.addf %30, %32 : vector<128x128xf32>
    %cst_21 = arith.constant 0.000000e+00 : f32
    %34 = vector.broadcast %cst_21 : f32 to vector<128x128xf32>
    %35 = arith.maximumf %33, %34 : vector<128x128xf32>
    %c640 = arith.constant 640 : index
    %c0_22 = arith.constant 0 : index
    %36 = vector.load %arg2[%c640, %c0_22] : memref<768x128xf32, #tpu.memory_space<vmem>>, vector<128x128xf32>
    %cst_23 = arith.constant dense<0.000000e+00> : vector<128x128xf32>
    %37 = tpu.matmul %36, %35, %cst_23 {dimension_numbers = #tpu.dot_dimension_numbers<[1], [0], [0], [1], [0, 0, 1, 1], [], []>} : vector<128x128xf32>, vector<128x128xf32>, vector<128x128xf32> -> vector<128x128xf32>
    %c0_24 = arith.constant 0 : index
    %c5 = arith.constant 5 : index
    %38 = vector.load %arg3[%c0_24, %c5] : memref<128x128xf32, #tpu.memory_space<vmem>>, vector<128x1xf32>
    %39 = vector.broadcast %38 : vector<128x1xf32> to vector<128x128xf32>
    %40 = arith.addf %37, %39 : vector<128x128xf32>
    %41 = vector.extract_strided_slice %40 {offsets = [0, 0], sizes = [1, 128], strides = [1, 1]} : vector<128x128xf32> to vector<1x128xf32>
    %c0_25 = arith.constant 0 : index
    %c0_26 = arith.constant 0 : index
    %42 = vector.load %arg4[%c0_25, %c0_26] : memref<1x128xf32, #tpu.memory_space<vmem>>, vector<1x128xf32>
    tpu.vector_store %arg4[%c0_25, %c0_26], %41 {strides = array<i32>} : memref<1x128xf32, #tpu.memory_space<vmem>>, vector<1x128xf32>,
    return
  }
  func.func @transform_0(%arg0: i32) -> (i32, i32) {
    %c0_i32 = arith.constant 0 : i32
    %c0_i32_0 = arith.constant 0 : i32
    return %c0_i32, %arg0 : i32, i32
  }
  func.func @transform_1(%arg0: i32) -> (i32, i32) {
    %c0_i32 = arith.constant 0 : i32
    %c0_i32_0 = arith.constant 0 : i32
    %c0_i32_1 = arith.constant 0 : i32
    return %c0_i32, %c0_i32_0 : i32, i32
  }
  func.func @transform_2(%arg0: i32) -> (i32, i32) {
    %c0_i32 = arith.constant 0 : i32
    %c0_i32_0 = arith.constant 0 : i32
    %c0_i32_1 = arith.constant 0 : i32
    return %c0_i32, %c0_i32_0 : i32, i32
  }
  func.func @transform_3(%arg0: i32) -> (i32, i32) {
    %c0_i32 = arith.constant 0 : i32
    %c0_i32_0 = arith.constant 0 : i32
    return %c0_i32, %arg0 : i32, i32
  }
}

</mosaic_0001>

<bundles_post_ra>
// kernel: obj_surrogate_forward.1
= control target key start
LH: loop header
LB: loop body
LE: loop exit
PB: predicated region body
PF: predicated region fallthrough
CT: control target
= control target key end

     0   :  { %8 = vsyncpa [#allocation3], 0  ;;  %s2475_s0 = inlined_call_operand.vmem [shape: f32[16,128], index: 0, kind: input, shape index: {}]   ;;  %s2476_s1 = inlined_call_operand.hbm [shape: f32[768,128], index: 1, kind: input, shape index: {}]   ;;  %s2477_s2 = inlined_call_operand.hbm [shape: f32[128,128], index: 2, kind: input, shape index: {}]   ;;  %s2478_s3 = inlined_call_operand.vmem [shape: f32[1,128], index: 3, kind: output, shape index: {}]  }
   0x1   :  { %9 = vsyncpa [#allocation5], 0  ;;  %s2284_s12 = smov [#allocation2]   ;;  %s2236_s16 = scalar_lea.hbm %s2476_s1, 12288 }
   0x2   :  { %s17_s13 = sshll.u32 %s2284_s12, 4  ;;  %p2237_p0 = scmp.ne.s32.totalorder %s2476_s1, %s2236_s16  ;;  %s18_s13 = int_to_ptr.vmem [resolvable:$true] %s17_s13 }
   0x3   :  { %p2240_p1 = scmp.lt.u32.totalorder %s2236_s16, %s2476_s1 }
   0x5   :  { %p2242_p2 = pnand %p2240_p1, %p2237_p0 }
   0x7   :  { %2245 = shalt.err (!%p2242_p2)
}
   0x8   :  { %s2246_s21 = scalar_lea.vmem %s18_s13, 12288  ;;  %p2251_p4 = scmp.lt.s32.totalorder %s18_s13, %s18_s13 }
   0x9   :  { %p2247_p3 = scmp.ne.s32.totalorder %s18_s13, %s2246_s21  ;;  %p2252_p5 = scmp.lt.s32.totalorder %s2246_s21, %s2246_s21 }
   0xb   :  { %p2253_p6 = por %p2252_p5, %p2251_p4 }
   0xd   :  { %p2254_p7 = pnand %p2253_p6, %p2247_p3 }
   0xf   :  { %2257 = shalt.err (!%p2254_p7)
}
  0x10   :  { %s2285_s22 = smov 128   ;;  %s2286_s23 = smov 8  }
  0x11   :  { %23 = dma.hbm_to_vmem [thread:$0]  %s2476_s1, 12288, %s18_s13, [#allocation3], %s2285_s22, %s2285_s22, %s2286_s23  }
  0x12   :  { %s2287_s26 = smov [#allocation4]   ;;  %s2258_s30 = scalar_lea.hbm %s2477_s2, 2048 }
  0x13   :  { %s29_s27 = sshll.u32 %s2287_s26, 4  ;;  %p2259_p8 = scmp.ne.s32.totalorder %s2477_s2, %s2258_s30  ;;  %s30_s27 = int_to_ptr.vmem [resolvable:$true] %s29_s27 }
  0x14   :  { %p2262_p9 = scmp.lt.u32.totalorder %s2258_s30, %s2477_s2 }
  0x16   :  { %p2264_p10 = pnand %p2262_p9, %p2259_p8 }
  0x18   :  { %2267 = shalt.err (!%p2264_p10)
}
  0x19   :  { %s2268_s8 = scalar_lea.vmem %s30_s27, 2048  ;;  %p2273_p12 = scmp.lt.s32.totalorder %s30_s27, %s30_s27 }
  0x1a   :  { %p2269_p11 = scmp.ne.s32.totalorder %s30_s27, %s2268_s8  ;;  %p2274_p13 = scmp.lt.s32.totalorder %s2268_s8, %s2268_s8 }
  0x1c   :  { %p2275_p0 = por %p2274_p13, %p2273_p12 }
  0x1e   :  { %p2276_p1 = pnand %p2275_p0, %p2269_p11 }
  0x20   :  { %2279 = shalt.err (!%p2276_p1)
}
  0x21   :  { %35 = dma.hbm_to_vmem [thread:$0]  %s2477_s2, 2048, %s30_s27, [#allocation5], %s2285_s22, %s2285_s22, %s2286_s23  }
  0x22   :  { %2280 = dma.done.wait [#allocation3], 12288  }
  0x23   :  { %2281 = vsyncadd [#allocation3], 4294955008 }
  0x24   :  { %2282 = dma.done.wait [#allocation5], 2048  }
  0x25   :  { %2283 = vsyncadd [#allocation5], 4294965248  ;;  %v2288_v0 = vmov 0   ;;  %vm156_vm0 = vcmask 130048   ;;  %v58_v1 = vld [vmem:[%s2475_s0] sm:$0xff]  ;;  %v59_v2 = vld [vmem:[%s2475_s0 + $0x8] sm:$0xff] }
  0x26   :  { %2224 = vset.pattern.permute.xlu0 %v2288_v0  ;;  %2225 = vset.pattern.permute.xlu1 %v2288_v0  ;;  %v42_v3 = vld [vmem:[#allocation2] sm:$0xff]  ;;  %v2034_v4 = vpack.c.bf16 %v59_v2, %v58_v1  ;;  %v43_v5 = vld [vmem:[#allocation2 + $0x8] sm:$0xff]  ;;  %v44_v6 = vld [vmem:[#allocation2 + $0x10] sm:$0xff]  ;;  %v2289_v37 = vmov 1  }
  0x27   :  { %1730 = vmatprep.mubr.msk.f32.mxu0 %vm156_vm0, %v42_v3  ;;  %v2345_v7 = vld [vmem:[#allocation4] sm:$0xff]  ;;  %v2347_v8 = vld [vmem:[#allocation4 + $0x10] sm:$0xff]  ;;  %v45_v9 = vld [vmem:[#allocation2 + $0x18] sm:$0xff] }
  0x28   :  { %2035 = vmatprep.subr.bf16.mxu0 %v2034_v4  ;;  %78 = vperm.xlu0 %2224, %v2345_v7   ;;  %v2353_v10 = vld [vmem:[#allocation4 + $0x8] sm:$0xff]  ;;  %v46_v11 = vld [vmem:[#allocation2 + $0x20] sm:$0xff]  ;;  %v2355_v12 = vld [vmem:[#allocation4 + $0x18] sm:$0xff] }
  0x29   :  { %2037 = vmatpush3.bf16.msra.mxu0 %v2034_v4  ;;  %88 = vperm.xlu1 %2225, %v2347_v8   ;;  %v47_v13 = vld [vmem:[#allocation2 + $0x28] sm:$0xff]  ;;  %v2361_v14 = vld [vmem:[#allocation4 + $0x20] sm:$0xff]  ;;  %v48_v15 = vld [vmem:[#allocation2 + $0x30] sm:$0xff] }
  0x2a   :  { %v2363_v16 = vld [vmem:[#allocation4 + $0x28] sm:$0xff]  ;;  %v49_v17 = vld [vmem:[#allocation2 + $0x38] sm:$0xff]  ;;  %v2369_v18 = vld [vmem:[#allocation4 + $0x30] sm:$0xff] }
  0x2b   :  { %v50_v19 = vld [vmem:[#allocation2 + $0x40] sm:$0xff]  ;;  %v2371_v20 = vld [vmem:[#allocation4 + $0x38] sm:$0xff]  ;;  %v51_v21 = vld [vmem:[#allocation2 + $0x48] sm:$0xff] }
  0x2c   :  { %1731 = vmatmul.mubr.msk.f32.vlgmr.msra.gmra.mrb[0].mxu0 %vm156_vm0, %v43_v5  ;;  %83 = vperm.xlu0 %2224, %v2353_v10   ;;  %v2377_v22 = vld [vmem:[#allocation4 + $0x40] sm:$0xff]  ;;  %v52_v23 = vld [vmem:[#allocation2 + $0x50] sm:$0xff]  ;;  %v2379_v24 = vld [vmem:[#allocation4 + $0x48] sm:$0xff] }
  0x2d   :  { %1733 = vmatprep.mubr.msk.f32.mxu0 %vm156_vm0, %v44_v6  ;;  %93 = vperm.xlu1 %2225, %v2355_v12   ;;  %v53_v25 = vld [vmem:[#allocation2 + $0x58] sm:$0xff]  ;;  %v2385_v26 = vld [vmem:[#allocation4 + $0x50] sm:$0xff]  ;;  %v54_v27 = vld [vmem:[#allocation2 + $0x60] sm:$0xff] }
  0x2e   :  { %v2387_v28 = vld [vmem:[#allocation4 + $0x58] sm:$0xff]  ;;  %v55_v29 = vld [vmem:[#allocation2 + $0x68] sm:$0xff]  ;;  %v2393_v30 = vld [vmem:[#allocation4 + $0x60] sm:$0xff] }
  0x2f   :  { %v56_v31 = vld [vmem:[#allocation2 + $0x70] sm:$0xff]  ;;  %v2395_v32 = vld [vmem:[#allocation4 + $0x68] sm:$0xff]  ;;  %v57_v33 = vld [vmem:[#allocation2 + $0x78] sm:$0xff] }
  0x30   :  { %1734 = vmatmul.mubr.msk.f32.gmra.mrb[2].mxu0 %vm156_vm0, %v45_v9  ;;  %98 = vperm.xlu0 %2224, %v2361_v14   ;;  %v2401_v34 = vld [vmem:[#allocation4 + $0x70] sm:$0xff]  ;;  %v2403_v35 = vld [vmem:[#allocation4 + $0x78] sm:$0xff]  ;;  %v366_v36 = vld [vmem:[#allocation2 + $0x80] sm:$0xff] }
  0x31   :  { %1736 = vmatprep.mubr.msk.f32.mxu0 %vm156_vm0, %v46_v11  ;;  %103 = vperm.xlu1 %2225, %v2363_v16  }
  0x32   :  { %1786 = vmatprep.mubr.f32.mxu1 %v366_v36 }
  0x34   :  { %1737 = vmatmul.mubr.msk.f32.gmra.mrb[4].mxu0 %vm156_vm0, %v47_v13  ;;  %108 = vperm.xlu0 %2224, %v2369_v18  }
  0x35   :  { %1739 = vmatprep.mubr.msk.f32.mxu0 %vm156_vm0, %v48_v15  ;;  %113 = vperm.xlu1 %2225, %v2371_v20  }
  0x38   :  { %1740 = vmatmul.mubr.msk.f32.gmra.mrb[6].mxu0 %vm156_vm0, %v49_v17  ;;  %118 = vperm.xlu0 %2224, %v2377_v22  }
  0x39   :  { %1742 = vmatprep.mubr.msk.f32.mxu0 %vm156_vm0, %v50_v19  ;;  %123 = vperm.xlu1 %2225, %v2379_v24  }
  0x3c   :  { %1743 = vmatmul.mubr.msk.f32.gmra.mrb[8].mxu0 %vm156_vm0, %v51_v21  ;;  %128 = vperm.xlu0 %2224, %v2385_v26  }
  0x3d   :  { %1745 = vmatprep.mubr.msk.f32.mxu0 %vm156_vm0, %v52_v23  ;;  %133 = vperm.xlu1 %2225, %v2387_v28  }
  0x40   :  { %1746 = vmatmul.mubr.msk.f32.gmra.mrb[10].mxu0 %vm156_vm0, %v53_v25  ;;  %138 = vperm.xlu0 %2224, %v2393_v30  }
  0x41   :  { %1748 = vmatprep.mubr.msk.f32.mxu0 %vm156_vm0, %v54_v27  ;;  %143 = vperm.xlu1 %2225, %v2395_v32  }
  0x44   :  { %1749 = vmatmul.mubr.msk.f32.gmra.mrb[12].mxu0 %vm156_vm0, %v55_v29  ;;  %148 = vperm.xlu0 %2224, %v2401_v34  }
  0x45   :  { %1751 = vmatprep.mubr.msk.f32.mxu0 %vm156_vm0, %v56_v31  ;;  %153 = vperm.xlu1 %2225, %v2403_v35  }
  0x48   :  { %1752 = vmatmul.mubr.msk.f32.gmra.mrb[14].mxu0 %vm156_vm0, %v57_v33  ;;  %2226 = vset.pattern.permute.xlu0 %v2289_v37 }
  0x49   :  { %2227 = vset.pattern.permute.xlu1 %v2289_v37  ;;  %383 = vperm.xlu0 %2226, %v2345_v7  }
  0x4a   :  { %387 = vperm.xlu1 %2227, %v2353_v10  }
  0x4d   :  { %395 = vperm.xlu0 %2226, %v2355_v12  }
  0x4e   :  { %391 = vperm.xlu1 %2227, %v2347_v8  }
  0x51   :  { %403 = vperm.xlu0 %2226, %v2363_v16  }
  0x52   :  { %399 = vperm.xlu1 %2227, %v2361_v14  }
  0x55   :  { %411 = vperm.xlu0 %2226, %v2371_v20  }
  0x56   :  { %407 = vperm.xlu1 %2227, %v2369_v18  }
  0x59   :  { %419 = vperm.xlu0 %2226, %v2379_v24  }
  0x5a   :  { %415 = vperm.xlu1 %2227, %v2377_v22  }
  0x5d   :  { %427 = vperm.xlu0 %2226, %v2387_v28  }
  0x5e   :  { %423 = vperm.xlu1 %2227, %v2385_v26  }
  0x61   :  { %435 = vperm.xlu0 %2226, %v2395_v32  }
  0x62   :  { %431 = vperm.xlu1 %2227, %v2393_v30  }
  0x65   :  { %443 = vperm.xlu0 %2226, %v2403_v35  }
  0x66   :  { %439 = vperm.xlu1 %2227, %v2401_v34  }
  0xa7   :  { %v79_v39 = vpop.permute.xlu0 %78 }
  0xa8   :  { %v89_v38 = vpop.permute.xlu1 %88 }
  0xab   :  { %v84_v41 = vpop.permute.xlu0 %83 }
  0xac   :  { %v94_v40 = vpop.permute.xlu1 %93 }
  0xaf   :  { %v99_v43 = vpop.permute.xlu0 %98 }
  0xb0   :  { %v104_v42 = vpop.permute.xlu1 %103 }
  0xb3   :  { %v109_v52 = vpop.permute.xlu0 %108 }
  0xb4   :  { %v114_v49 = vpop.permute.xlu1 %113 }
  0xb7   :  { %v119_v1 = vpop.permute.xlu0 %118 }
  0xb8   :  { %v124_v62 = vpop.permute.xlu1 %123 }
  0xbb   :  { %v129_v21 = vpop.permute.xlu0 %128 }
  0xbc   :  { %v134_v15 = vpop.permute.xlu1 %133 }
  0xff   :  { %v1732_v44 = vpop.f32.mrb[0].mxu0 }
 0x100   :  { %v277_v45 = vadd.f32 %v1732_v44, %v84_v41  ;;  %v271_v46 = vpop.f32.mrb[1].mxu0 }
 0x101   :  { %v272_v47 = vadd.f32 %v271_v46, %v79_v39  ;;  %v144_v39 = vpop.permute.xlu1 %143 }
 0x102   :  { %v351_v48 = vmax.f32 %v277_v45, 0.0 }
 0x103   :  { %v350_v50 = vmax.f32 %v272_v47, 0.0  ;;  %v1735_v51 = vpop.f32.mrb[2].mxu0 }
 0x104   :  { %v287_v53 = vadd.f32 %v1735_v51, %v94_v40  ;;  %v281_v54 = vpop.f32.mrb[3].mxu0 }
 0x105   :  { %v282_v55 = vadd.f32 %v281_v54, %v89_v38  ;;  %v2038_v56 = vpack.c.bf16 %v351_v48, %v350_v50  ;;  %v154_v51 = vpop.permute.xlu1 %153 }
 0x106   :  { %v353_v57 = vmax.f32 %v287_v53, 0.0 }
 0x107   :  { %v352_v58 = vmax.f32 %v282_v55, 0.0  ;;  %v1738_v59 = vpop.f32.mrb[4].mxu0  ;;  %2039 = vmatprep.subr.bf16.mxu1 %v2038_v56 }
 0x108   :  { %v297_v60 = vadd.f32 %v1738_v59, %v104_v42  ;;  %v291_v61 = vpop.f32.mrb[5].mxu0  ;;  %2041 = vmatpush3.bf16.msra.mxu1 %v2038_v56  ;;  %v139_v42 = vpop.permute.xlu0 %138 }
 0x109   :  { %v2042_v63 = vpack.c.bf16 %v353_v57, %v352_v58  ;;  %v292_v0 = vadd.f32 %v291_v61, %v99_v43 }
 0x10a   :  { %v355_v2 = vmax.f32 %v297_v60, 0.0 }
 0x10b   :  { %v354_v3 = vmax.f32 %v292_v0, 0.0  ;;  %v1741_v4 = vpop.f32.mrb[6].mxu0  ;;  %2043 = vmatprep.subr.bf16.mxu1 %v2042_v63  ;;  %v369_v0 = vld [vmem:[#allocation2 + $0x98] sm:$0xff] }
 0x10c   :  { %v307_v5 = vadd.f32 %v1741_v4, %v114_v49  ;;  %v301_v6 = vpop.f32.mrb[7].mxu0  ;;  %2045 = vmatpush3.bf16.msra.mxu1 %v2042_v63  ;;  %v149_v54 = vpop.permute.xlu0 %148  ;;  %v368_v63 = vld [vmem:[#allocation2 + $0x90] sm:$0xff]  ;;  %v373_v4 = vld [vmem:[#allocation2 + $0xb8] sm:$0xff] }
 0x10d   :  { %v2046_v9 = vpack.c.bf16 %v355_v2, %v354_v3  ;;  %v302_v11 = vadd.f32 %v301_v6, %v109_v52  ;;  %v371_v2 = vld [vmem:[#allocation2 + $0xa8] sm:$0xff]  ;;  %v372_v3 = vld [vmem:[#allocation2 + $0xb0] sm:$0xff] }
 0x10e   :  { %v357_v13 = vmax.f32 %v307_v5, 0.0  ;;  %v374_v5 = vld [vmem:[#allocation2 + $0xc0] sm:$0xff]  ;;  %v375_v6 = vld [vmem:[#allocation2 + $0xc8] sm:$0xff] }
 0x10f   :  { %v356_v17 = vmax.f32 %v302_v11, 0.0  ;;  %v1744_v19 = vpop.f32.mrb[8].mxu0  ;;  %2047 = vmatprep.subr.bf16.mxu1 %v2046_v9  ;;  %v377_v11 = vld [vmem:[#allocation2 + $0xd8] sm:$0xff] }
 0x110   :  { %v317_v23 = vadd.f32 %v1744_v19, %v124_v62  ;;  %v311_v25 = vpop.f32.mrb[9].mxu0  ;;  %2049 = vmatpush3.bf16.msra.mxu1 %v2046_v9  ;;  %v367_v62 = vld [vmem:[#allocation2 + $0x88] sm:$0xff]  ;;  %v376_v9 = vld [vmem:[#allocation2 + $0xd0] sm:$0xff]  ;;  %v381_v19 = vld [vmem:[#allocation2 + $0xf8] sm:$0xff] }
 0x111   :  { %v2050_v27 = vpack.c.bf16 %v357_v13, %v356_v17  ;;  %v312_v29 = vadd.f32 %v311_v25, %v119_v1  ;;  %v370_v1 = vld [vmem:[#allocation2 + $0xa0] sm:$0xff]  ;;  %v380_v17 = vld [vmem:[#allocation2 + $0xf0] sm:$0xff]  ;;  %v384_v25 = vpop.permute.xlu0 %383 }
 0x112   :  { %v359_v31 = vmax.f32 %v317_v23, 0.0  ;;  %v378_v13 = vld [vmem:[#allocation2 + $0xe0] sm:$0xff]  ;;  %v2290_v23 = vmov 2  }
 0x113   :  { %v358_v33 = vmax.f32 %v312_v29, 0.0  ;;  %v1747_v36 = vpop.f32.mrb[10].mxu0  ;;  %2051 = vmatprep.subr.bf16.mxu1 %v2050_v27  ;;  %2228 = vset.pattern.permute.xlu1 %v2290_v23 }
 0x114   :  { %v327_v37 = vadd.f32 %v1747_v36, %v134_v15  ;;  %v321_v38 = vpop.f32.mrb[11].mxu0  ;;  %2053 = vmatpush3.bf16.msra.mxu1 %v2050_v27  ;;  %v379_v15 = vld [vmem:[#allocation2 + $0xe8] sm:$0xff]  ;;  %2229 = vset.pattern.permute.xlu0 %v2290_v23  ;;  %v388_v27 = vpop.permute.xlu1 %387 }
 0x115   :  { %v2054_v40 = vpack.c.bf16 %v359_v31, %v358_v33  ;;  %v322_v41 = vadd.f32 %v321_v38, %v129_v21  ;;  %v607_v21 = vld [vmem:[#allocation2 + $0x100] sm:$0xff]  ;;  %624 = vperm.xlu1 %2228, %v2345_v7   ;;  %628 = vperm.xlu0 %2229, %v2353_v10   ;;  %v396_v29 = vpop.permute.xlu0 %395 }
 0x116   :  { %v361_v43 = vmax.f32 %v327_v37, 0.0  ;;  %1842 = vmatprep.mubr.f32.mxu0 %v607_v21 }
 0x117   :  { %v360_v44 = vmax.f32 %v322_v41, 0.0  ;;  %v1750_v45 = vpop.f32.mrb[12].mxu0  ;;  %2055 = vmatprep.subr.bf16.mxu1 %v2054_v40 }
 0x118   :  { %v337_v46 = vadd.f32 %v1750_v45, %v144_v39  ;;  %v331_v47 = vpop.f32.mrb[13].mxu0  ;;  %2057 = vmatpush3.bf16.msra.mxu1 %v2054_v40  ;;  %v392_v31 = vpop.permute.xlu1 %391 }
 0x119   :  { %v2058_v48 = vpack.c.bf16 %v361_v43, %v360_v44  ;;  %v332_v49 = vadd.f32 %v331_v47, %v139_v42  ;;  %632 = vperm.xlu1 %2228, %v2347_v8   ;;  %640 = vperm.xlu0 %2229, %v2361_v14   ;;  %v404_v33 = vpop.permute.xlu0 %403 }
 0x11a   :  { %v363_v50 = vmax.f32 %v337_v46, 0.0 }
 0x11b   :  { %v362_v52 = vmax.f32 %v332_v49, 0.0  ;;  %v1753_v53 = vpop.f32.mrb[14].mxu0  ;;  %2059 = vmatprep.subr.bf16.mxu1 %v2058_v48 }
 0x11c   :  { %v347_v55 = vadd.f32 %v1753_v53, %v154_v51  ;;  %v341_v56 = vpop.f32.mrb[15].mxu0  ;;  %2061 = vmatpush3.bf16.msra.mxu1 %v2058_v48  ;;  %v400_v36 = vpop.permute.xlu1 %399 }
 0x11d   :  { %v2062_v57 = vpack.c.bf16 %v363_v50, %v362_v52  ;;  %v342_v58 = vadd.f32 %v341_v56, %v149_v54  ;;  %636 = vperm.xlu1 %2228, %v2355_v12   ;;  %648 = vperm.xlu0 %2229, %v2369_v18   ;;  %v412_v42 = vpop.permute.xlu0 %411 }
 0x11e   :  { %v365_v59 = vmax.f32 %v347_v55, 0.0 }
 0x11f   :  { %v364_v60 = vmax.f32 %v342_v58, 0.0  ;;  %2063 = vmatprep.subr.bf16.mxu1 %v2062_v57 }
 0x120   :  { %2065 = vmatpush3.bf16.msra.mxu1 %v2062_v57  ;;  %v408_v45 = vpop.permute.xlu1 %407 }
 0x121   :  { %v2066_v61 = vpack.c.bf16 %v365_v59, %v364_v60  ;;  %644 = vperm.xlu1 %2228, %v2363_v16   ;;  %656 = vperm.xlu0 %2229, %v2377_v22   ;;  %v420_v55 = vpop.permute.xlu0 %419 }
 0x123   :  { %2067 = vmatprep.subr.bf16.mxu1 %v2066_v61 }
 0x124   :  { %2069 = vmatpush3.bf16.msra.mxu1 %v2066_v61  ;;  %v416_v58 = vpop.permute.xlu1 %415 }
 0x125   :  { %652 = vperm.xlu1 %2228, %v2371_v20   ;;  %664 = vperm.xlu0 %2229, %v2385_v26  }
 0x127   :  { %1787 = vmatmul.mubr.f32.vlgmr.msra.gmra.mrb[0].mxu1 %v367_v62 }
 0x128   :  { %1789 = vmatprep.mubr.f32.mxu1 %v368_v63 }
 0x129   :  { %660 = vperm.xlu1 %2228, %v2379_v24   ;;  %672 = vperm.xlu0 %2229, %v2393_v30  }
 0x12b   :  { %1790 = vmatmul.mubr.f32.gmra.mrb[2].mxu1 %v369_v0 }
 0x12c   :  { %1792 = vmatprep.mubr.f32.mxu1 %v370_v1 }
 0x12d   :  { %668 = vperm.xlu1 %2228, %v2387_v28   ;;  %680 = vperm.xlu0 %2229, %v2401_v34  }
 0x12f   :  { %1793 = vmatmul.mubr.f32.gmra.mrb[4].mxu1 %v371_v2 }
 0x130   :  { %1795 = vmatprep.mubr.f32.mxu1 %v372_v3  ;;  %v428_v3 = vpop.permute.xlu0 %427 }
 0x131   :  { %676 = vperm.xlu1 %2228, %v2395_v32  }
 0x133   :  { %1796 = vmatmul.mubr.f32.gmra.mrb[6].mxu1 %v373_v4 }
 0x134   :  { %1798 = vmatprep.mubr.f32.mxu1 %v374_v5 }
 0x135   :  { %684 = vperm.xlu1 %2228, %v2403_v35  }
 0x137   :  { %1799 = vmatmul.mubr.f32.gmra.mrb[8].mxu1 %v375_v6  ;;  %v424_v6 = vpop.permute.xlu1 %423 }
 0x138   :  { %1801 = vmatprep.mubr.f32.mxu1 %v376_v9 }
 0x13b   :  { %1802 = vmatmul.mubr.f32.gmra.mrb[10].mxu1 %v377_v11 }
 0x13c   :  { %1804 = vmatprep.mubr.f32.mxu1 %v378_v13 }
 0x13f   :  { %1805 = vmatmul.mubr.f32.gmra.mrb[12].mxu1 %v379_v15 }
 0x140   :  { %1807 = vmatprep.mubr.f32.mxu1 %v380_v17 }
 0x143   :  { %1808 = vmatmul.mubr.f32.gmra.mrb[14].mxu1 %v381_v19 }
 0x1fa   :  { %v1788_v37 = vpop.f32.mrb[0].mxu1 }
 0x1fb   :  { %v518_v38 = vadd.f32 %v1788_v37, %v388_v27  ;;  %v512_v39 = vpop.f32.mrb[1].mxu1  ;;  %v436_v27 = vpop.permute.xlu0 %435 }
 0x1fc   :  { %v513_v40 = vadd.f32 %v512_v39, %v384_v25 }
 0x1fd   :  { %v592_v41 = vmax.f32 %v518_v38, 0.0 }
 0x1fe   :  { %v591_v43 = vmax.f32 %v513_v40, 0.0  ;;  %v1791_v44 = vpop.f32.mrb[2].mxu1 }
 0x1ff   :  { %v528_v46 = vadd.f32 %v1791_v44, %v396_v29  ;;  %v522_v47 = vpop.f32.mrb[3].mxu1  ;;  %v444_v44 = vpop.permute.xlu0 %443 }
 0x200   :  { %v2070_v48 = vpack.c.bf16 %v592_v41, %v591_v43  ;;  %v523_v49 = vadd.f32 %v522_v47, %v392_v31 }
 0x201   :  { %v594_v50 = vmax.f32 %v528_v46, 0.0 }
 0x202   :  { %v593_v51 = vmax.f32 %v523_v49, 0.0  ;;  %v1794_v52 = vpop.f32.mrb[4].mxu1  ;;  %2071 = vmatprep.subr.bf16.mxu0 %v2070_v48 }
 0x203   :  { %v538_v53 = vadd.f32 %v1794_v52, %v404_v33  ;;  %v532_v54 = vpop.f32.mrb[5].mxu1  ;;  %2073 = vmatpush3.bf16.msra.mxu0 %v2070_v48  ;;  %v432_v33 = vpop.permute.xlu1 %431 }
 0x204   :  { %v2074_v56 = vpack.c.bf16 %v594_v50, %v593_v51  ;;  %v533_v57 = vadd.f32 %v532_v54, %v400_v36 }
 0x205   :  { %v596_v59 = vmax.f32 %v538_v53, 0.0 }
 0x206   :  { %v595_v60 = vmax.f32 %v533_v57, 0.0  ;;  %v1797_v61 = vpop.f32.mrb[6].mxu1  ;;  %2075 = vmatprep.subr.bf16.mxu0 %v2074_v56  ;;  %v610_v57 = vld [vmem:[#allocation2 + $0x118] sm:$0xff] }
 0x207   :  { %v548_v62 = vadd.f32 %v1797_v61, %v412_v42  ;;  %v542_v63 = vpop.f32.mrb[7].mxu1  ;;  %2077 = vmatpush3.bf16.msra.mxu0 %v2074_v56  ;;  %v440_v47 = vpop.permute.xlu1 %439  ;;  %v609_v56 = vld [vmem:[#allocation2 + $0x110] sm:$0xff]  ;;  %v614_v61 = vld [vmem:[#allocation2 + $0x138] sm:$0xff] }
 0x208   :  { %v2078_v0 = vpack.c.bf16 %v596_v59, %v595_v60  ;;  %v543_v1 = vadd.f32 %v542_v63, %v408_v45  ;;  %v612_v59 = vld [vmem:[#allocation2 + $0x128] sm:$0xff]  ;;  %v613_v60 = vld [vmem:[#allocation2 + $0x130] sm:$0xff] }
 0x209   :  { %v598_v2 = vmax.f32 %v548_v62, 0.0  ;;  %v615_v62 = vld [vmem:[#allocation2 + $0x140] sm:$0xff]  ;;  %v616_v63 = vld [vmem:[#allocation2 + $0x148] sm:$0xff] }
 0x20a   :  { %v597_v4 = vmax.f32 %v543_v1, 0.0  ;;  %v1800_v5 = vpop.f32.mrb[8].mxu1  ;;  %2079 = vmatprep.subr.bf16.mxu0 %v2078_v0  ;;  %v618_v1 = vld [vmem:[#allocation2 + $0x158] sm:$0xff] }
 0x20b   :  { %v558_v9 = vadd.f32 %v1800_v5, %v420_v55  ;;  %v552_v11 = vpop.f32.mrb[9].mxu1  ;;  %2081 = vmatpush3.bf16.msra.mxu0 %v2078_v0  ;;  %v608_v55 = vld [vmem:[#allocation2 + $0x108] sm:$0xff]  ;;  %v617_v0 = vld [vmem:[#allocation2 + $0x150] sm:$0xff]  ;;  %v622_v5 = vld [vmem:[#allocation2 + $0x178] sm:$0xff] }
 0x20c   :  { %v2082_v13 = vpack.c.bf16 %v598_v2, %v597_v4  ;;  %v553_v15 = vadd.f32 %v552_v11, %v416_v58  ;;  %v611_v58 = vld [vmem:[#allocation2 + $0x120] sm:$0xff]  ;;  %v621_v4 = vld [vmem:[#allocation2 + $0x170] sm:$0xff]  ;;  %v625_v11 = vpop.permute.xlu1 %624 }
 0x20d   :  { %v600_v17 = vmax.f32 %v558_v9, 0.0  ;;  %v619_v2 = vld [vmem:[#allocation2 + $0x160] sm:$0xff]  ;;  %v2291_v9 = vmov 3  }
 0x20e   :  { %v599_v19 = vmax.f32 %v553_v15, 0.0  ;;  %v1803_v21 = vpop.f32.mrb[10].mxu1  ;;  %2083 = vmatprep.subr.bf16.mxu0 %v2082_v13  ;;  %2231 = vset.pattern.permute.xlu1 %v2291_v9 }
 0x20f   :  { %v568_v23 = vadd.f32 %v1803_v21, %v428_v3  ;;  %v562_v25 = vpop.f32.mrb[11].mxu1  ;;  %2085 = vmatpush3.bf16.msra.mxu0 %v2082_v13  ;;  %v620_v3 = vld [vmem:[#allocation2 + $0x168] sm:$0xff]  ;;  %2230 = vset.pattern.permute.xlu0 %v2291_v9 }
 0x210   :  { %v2086_v29 = vpack.c.bf16 %v600_v17, %v599_v19  ;;  %v563_v31 = vadd.f32 %v562_v25, %v424_v6  ;;  %v848_v6 = vld [vmem:[#allocation2 + $0x180] sm:$0xff]  ;;  %869 = vperm.xlu1 %2231, %v2353_v10   ;;  %865 = vperm.xlu0 %2230, %v2345_v7   ;;  %v633_v13 = vpop.permute.xlu1 %632  ;;  %v629_v17 = vpop.permute.xlu0 %628 }
 0x211   :  { %v602_v36 = vmax.f32 %v568_v23, 0.0  ;;  %1898 = vmatprep.mubr.f32.mxu1 %v848_v6 }
 0x212   :  { %v601_v37 = vmax.f32 %v563_v31, 0.0  ;;  %v1806_v38 = vpop.f32.mrb[12].mxu1  ;;  %2087 = vmatprep.subr.bf16.mxu0 %v2086_v29 }
 0x213   :  { %v578_v39 = vadd.f32 %v1806_v38, %v436_v27  ;;  %v572_v40 = vpop.f32.mrb[13].mxu1  ;;  %2089 = vmatpush3.bf16.msra.mxu0 %v2086_v29 }
 0x214   :  { %v2090_v41 = vpack.c.bf16 %v602_v36, %v601_v37  ;;  %v573_v42 = vadd.f32 %v572_v40, %v432_v33  ;;  %873 = vperm.xlu1 %2231, %v2347_v8   ;;  %877 = vperm.xlu0 %2230, %v2355_v12   ;;  %v637_v15 = vpop.permute.xlu1 %636  ;;  %v641_v21 = vpop.permute.xlu0 %640 }
 0x215   :  { %v604_v43 = vmax.f32 %v578_v39, 0.0 }
 0x216   :  { %v603_v45 = vmax.f32 %v573_v42, 0.0  ;;  %v1809_v46 = vpop.f32.mrb[14].mxu1  ;;  %2091 = vmatprep.subr.bf16.mxu0 %v2090_v41 }
 0x217   :  { %v588_v48 = vadd.f32 %v1809_v46, %v444_v44  ;;  %v582_v49 = vpop.f32.mrb[15].mxu1  ;;  %2093 = vmatpush3.bf16.msra.mxu0 %v2090_v41 }
 0x218   :  { %v2094_v50 = vpack.c.bf16 %v604_v43, %v603_v45  ;;  %v583_v51 = vadd.f32 %v582_v49, %v440_v47  ;;  %881 = vperm.xlu1 %2231, %v2361_v14   ;;  %885 = vperm.xlu0 %2230, %v2363_v16   ;;  %v645_v19 = vpop.permute.xlu1 %644  ;;  %v649_v38 = vpop.permute.xlu0 %648 }
 0x219   :  { %v606_v52 = vmax.f32 %v588_v48, 0.0 }
 0x21a   :  { %v605_v53 = vmax.f32 %v583_v51, 0.0  ;;  %2095 = vmatprep.subr.bf16.mxu0 %v2094_v50 }
 0x21b   :  { %2097 = vmatpush3.bf16.msra.mxu0 %v2094_v50 }
 0x21c   :  { %v2098_v54 = vpack.c.bf16 %v606_v52, %v605_v53  ;;  %889 = vperm.xlu1 %2231, %v2369_v18   ;;  %893 = vperm.xlu0 %2230, %v2371_v20   ;;  %v653_v33 = vpop.permute.xlu1 %652  ;;  %v657_v51 = vpop.permute.xlu0 %656 }
 0x21e   :  { %2099 = vmatprep.subr.bf16.mxu0 %v2098_v54 }
 0x21f   :  { %2101 = vmatpush3.bf16.msra.mxu0 %v2098_v54 }
 0x220   :  { %897 = vperm.xlu1 %2231, %v2377_v22   ;;  %901 = vperm.xlu0 %2230, %v2379_v24   ;;  %v661_v48 = vpop.permute.xlu1 %660 }
 0x222   :  { %1843 = vmatmul.mubr.f32.vlgmr.msra.gmra.mrb[16].mxu0 %v608_v55 }
 0x223   :  { %1845 = vmatprep.mubr.f32.mxu0 %v609_v56 }
 0x224   :  { %905 = vperm.xlu1 %2231, %v2385_v26   ;;  %909 = vperm.xlu0 %2230, %v2387_v28  }
 0x226   :  { %1846 = vmatmul.mubr.f32.gmra.mrb[18].mxu0 %v610_v57 }
 0x227   :  { %1848 = vmatprep.mubr.f32.mxu0 %v611_v58 }
 0x228   :  { %913 = vperm.xlu1 %2231, %v2393_v30   ;;  %917 = vperm.xlu0 %2230, %v2395_v32  }
 0x22a   :  { %1849 = vmatmul.mubr.f32.gmra.mrb[20].mxu0 %v612_v59 }
 0x22b   :  { %1851 = vmatprep.mubr.f32.mxu0 %v613_v60  ;;  %v669_v60 = vpop.permute.xlu1 %668 }
 0x22c   :  { %921 = vperm.xlu1 %2231, %v2401_v34   ;;  %925 = vperm.xlu0 %2230, %v2403_v35  }
 0x22e   :  { %1852 = vmatmul.mubr.f32.gmra.mrb[22].mxu0 %v614_v61 }
 0x22f   :  { %1854 = vmatprep.mubr.f32.mxu0 %v615_v62 }
 0x232   :  { %1855 = vmatmul.mubr.f32.gmra.mrb[24].mxu0 %v616_v63  ;;  %v665_v63 = vpop.permute.xlu0 %664 }
 0x233   :  { %1857 = vmatprep.mubr.f32.mxu0 %v617_v0 }
 0x236   :  { %1858 = vmatmul.mubr.f32.gmra.mrb[26].mxu0 %v618_v1 }
 0x237   :  { %1860 = vmatprep.mubr.f32.mxu0 %v619_v2 }
 0x23a   :  { %1861 = vmatmul.mubr.f32.gmra.mrb[28].mxu0 %v620_v3 }
 0x23b   :  { %1863 = vmatprep.mubr.f32.mxu0 %v621_v4 }
 0x23e   :  { %1864 = vmatmul.mubr.f32.gmra.mrb[30].mxu0 %v622_v5 }
 0x2f5   :  { %v1844_v23 = vpop.f32.mrb[16].mxu0 }
 0x2f6   :  { %v759_v25 = vadd.f32 %v1844_v23, %v629_v17  ;;  %v753_v27 = vpop.f32.mrb[17].mxu0 }
 0x2f7   :  { %v754_v29 = vadd.f32 %v753_v27, %v625_v11 }
 0x2f8   :  { %v833_v31 = vmax.f32 %v759_v25, 0.0 }
 0x2f9   :  { %v832_v36 = vmax.f32 %v754_v29, 0.0  ;;  %v1847_v37 = vpop.f32.mrb[18].mxu0 }
 0x2fa   :  { %v769_v39 = vadd.f32 %v1847_v37, %v637_v15  ;;  %v763_v40 = vpop.f32.mrb[19].mxu0 }
 0x2fb   :  { %v2102_v41 = vpack.c.bf16 %v833_v31, %v832_v36  ;;  %v764_v42 = vadd.f32 %v763_v40, %v633_v13  ;;  %v677_v13 = vpop.permute.xlu1 %676 }
 0x2fc   :  { %v835_v43 = vmax.f32 %v769_v39, 0.0 }
 0x2fd   :  { %v834_v44 = vmax.f32 %v764_v42, 0.0  ;;  %v1850_v45 = vpop.f32.mrb[20].mxu0  ;;  %2103 = vmatprep.subr.bf16.mxu1 %v2102_v41 }
 0x2fe   :  { %v779_v46 = vadd.f32 %v1850_v45, %v645_v19  ;;  %v773_v47 = vpop.f32.mrb[21].mxu0  ;;  %2105 = vmatpush3.bf16.msra.mxu1 %v2102_v41  ;;  %v673_v19 = vpop.permute.xlu0 %672 }
 0x2ff   :  { %v2106_v49 = vpack.c.bf16 %v835_v43, %v834_v44  ;;  %v774_v50 = vadd.f32 %v773_v47, %v641_v21  ;;  %v685_v37 = vpop.permute.xlu1 %684 }
 0x300   :  { %v837_v52 = vmax.f32 %v779_v46, 0.0 }
 0x301   :  { %v836_v53 = vmax.f32 %v774_v50, 0.0  ;;  %v1853_v54 = vpop.f32.mrb[22].mxu0  ;;  %2107 = vmatprep.subr.bf16.mxu1 %v2106_v49  ;;  %v851_v50 = vld [vmem:[#allocation2 + $0x198] sm:$0xff] }
 0x302   :  { %v789_v55 = vadd.f32 %v1853_v54, %v653_v33  ;;  %v783_v56 = vpop.f32.mrb[23].mxu0  ;;  %2109 = vmatpush3.bf16.msra.mxu1 %v2106_v49  ;;  %v681_v40 = vpop.permute.xlu0 %680  ;;  %v850_v49 = vld [vmem:[#allocation2 + $0x190] sm:$0xff]  ;;  %v855_v54 = vld [vmem:[#allocation2 + $0x1b8] sm:$0xff] }
 0x303   :  { %v2110_v57 = vpack.c.bf16 %v837_v52, %v836_v53  ;;  %v784_v58 = vadd.f32 %v783_v56, %v649_v38  ;;  %v853_v52 = vld [vmem:[#allocation2 + $0x1a8] sm:$0xff]  ;;  %v854_v53 = vld [vmem:[#allocation2 + $0x1b0] sm:$0xff] }
 0x304   :  { %v839_v59 = vmax.f32 %v789_v55, 0.0  ;;  %v856_v55 = vld [vmem:[#allocation2 + $0x1c0] sm:$0xff]  ;;  %v857_v56 = vld [vmem:[#allocation2 + $0x1c8] sm:$0xff] }
 0x305   :  { %v838_v61 = vmax.f32 %v784_v58, 0.0  ;;  %v1856_v62 = vpop.f32.mrb[24].mxu0  ;;  %2111 = vmatprep.subr.bf16.mxu1 %v2110_v57  ;;  %v859_v58 = vld [vmem:[#allocation2 + $0x1d8] sm:$0xff] }
 0x306   :  { %v799_v0 = vadd.f32 %v1856_v62, %v661_v48  ;;  %v793_v1 = vpop.f32.mrb[25].mxu0  ;;  %2113 = vmatpush3.bf16.msra.mxu1 %v2110_v57  ;;  %v849_v48 = vld [vmem:[#allocation2 + $0x188] sm:$0xff]  ;;  %v858_v57 = vld [vmem:[#allocation2 + $0x1d0] sm:$0xff]  ;;  %v863_v62 = vld [vmem:[#allocation2 + $0x1f8] sm:$0xff] }
 0x307   :  { %v2114_v2 = vpack.c.bf16 %v839_v59, %v838_v61  ;;  %v794_v3 = vadd.f32 %v793_v1, %v657_v51  ;;  %v852_v51 = vld [vmem:[#allocation2 + $0x1a0] sm:$0xff]  ;;  %v862_v61 = vld [vmem:[#allocation2 + $0x1f0] sm:$0xff] }
 0x308   :  { %v841_v4 = vmax.f32 %v799_v0, 0.0  ;;  %v860_v59 = vld [vmem:[#allocation2 + $0x1e0] sm:$0xff]  ;;  %v2292_v0 = vmov 4  }
 0x309   :  { %v840_v5 = vmax.f32 %v794_v3, 0.0  ;;  %v1859_v6 = vpop.f32.mrb[26].mxu0  ;;  %2115 = vmatprep.subr.bf16.mxu1 %v2114_v2  ;;  %2232 = vset.pattern.permute.xlu1 %v2292_v0 }
 0x30a   :  { %v809_v9 = vadd.f32 %v1859_v6, %v669_v60  ;;  %v803_v11 = vpop.f32.mrb[27].mxu0  ;;  %2117 = vmatpush3.bf16.msra.mxu1 %v2114_v2  ;;  %v861_v60 = vld [vmem:[#allocation2 + $0x1e8] sm:$0xff]  ;;  %2233 = vset.pattern.permute.xlu0 %v2292_v0 }
 0x30b   :  { %v2118_v15 = vpack.c.bf16 %v841_v4, %v840_v5  ;;  %v804_v17 = vadd.f32 %v803_v11, %v665_v63  ;;  %v1089_v63 = vld [vmem:[#allocation2 + $0x200] sm:$0xff]  ;;  %1106 = vperm.xlu1 %2232, %v2345_v7   ;;  %1110 = vperm.xlu0 %2233, %v2353_v10   ;;  %v866_v7 = vpop.permute.xlu0 %865 }
 0x30c   :  { %v843_v21 = vmax.f32 %v809_v9, 0.0  ;;  %1954 = vmatprep.mubr.f32.mxu0 %v1089_v63 }
 0x30d   :  { %v842_v23 = vmax.f32 %v804_v17, 0.0  ;;  %v1862_v25 = vpop.f32.mrb[28].mxu0  ;;  %2119 = vmatprep.subr.bf16.mxu1 %v2118_v15 }
 0x30e   :  { %v819_v27 = vadd.f32 %v1862_v25, %v677_v13  ;;  %v813_v29 = vpop.f32.mrb[29].mxu0  ;;  %2121 = vmatpush3.bf16.msra.mxu1 %v2118_v15 }
 0x30f   :  { %v2122_v31 = vpack.c.bf16 %v843_v21, %v842_v23  ;;  %v814_v33 = vadd.f32 %v813_v29, %v673_v19  ;;  %1114 = vperm.xlu1 %2232, %v2347_v8   ;;  %1122 = vperm.xlu0 %2233, %v2361_v14   ;;  %v870_v8 = vpop.permute.xlu1 %869  ;;  %v878_v10 = vpop.permute.xlu0 %877 }
 0x310   :  { %v845_v36 = vmax.f32 %v819_v27, 0.0 }
 0x311   :  { %v844_v38 = vmax.f32 %v814_v33, 0.0  ;;  %v1865_v39 = vpop.f32.mrb[30].mxu0  ;;  %2123 = vmatprep.subr.bf16.mxu1 %v2122_v31 }
 0x312   :  { %v829_v41 = vadd.f32 %v1865_v39, %v685_v37  ;;  %v823_v42 = vpop.f32.mrb[31].mxu0  ;;  %2125 = vmatpush3.bf16.msra.mxu1 %v2122_v31 }
 0x313   :  { %v2126_v43 = vpack.c.bf16 %v845_v36, %v844_v38  ;;  %v824_v44 = vadd.f32 %v823_v42, %v681_v40  ;;  %1118 = vperm.xlu1 %2232, %v2355_v12   ;;  %1130 = vperm.xlu0 %2233, %v2369_v18   ;;  %v874_v12 = vpop.permute.xlu1 %873  ;;  %v886_v14 = vpop.permute.xlu0 %885 }
 0x314   :  { %v847_v45 = vmax.f32 %v829_v41, 0.0 }
 0x315   :  { %v846_v46 = vmax.f32 %v824_v44, 0.0  ;;  %2127 = vmatprep.subr.bf16.mxu1 %v2126_v43 }
 0x316   :  { %2129 = vmatpush3.bf16.msra.mxu1 %v2126_v43 }
 0x317   :  { %v2130_v47 = vpack.c.bf16 %v847_v45, %v846_v46  ;;  %1126 = vperm.xlu1 %2232, %v2363_v16   ;;  %1138 = vperm.xlu0 %2233, %v2377_v22   ;;  %v882_v16 = vpop.permute.xlu1 %881 }
 0x319   :  { %2131 = vmatprep.subr.bf16.mxu1 %v2130_v47 }
 0x31a   :  { %2133 = vmatpush3.bf16.msra.mxu1 %v2130_v47 }
 0x31b   :  { %1134 = vperm.xlu1 %2232, %v2371_v20   ;;  %1146 = vperm.xlu0 %2233, %v2385_v26   ;;  %v890_v2 = vpop.permute.xlu1 %889 }
 0x31d   :  { %1899 = vmatmul.mubr.f32.vlgmr.msra.gmra.mrb[16].mxu1 %v849_v48 }
 0x31e   :  { %1901 = vmatprep.mubr.f32.mxu1 %v850_v49 }
 0x31f   :  { %1142 = vperm.xlu1 %2232, %v2379_v24   ;;  %1154 = vperm.xlu0 %2233, %v2393_v30   ;;  %v894_v30 = vpop.permute.xlu0 %893  ;;  %v898_v19 = vpop.permute.xlu1 %897 }
 0x321   :  { %1902 = vmatmul.mubr.f32.gmra.mrb[18].mxu1 %v851_v50 }
 0x322   :  { %1904 = vmatprep.mubr.f32.mxu1 %v852_v51 }
 0x323   :  { %1150 = vperm.xlu1 %2232, %v2387_v28   ;;  %1162 = vperm.xlu0 %2233, %v2401_v34   ;;  %v902_v13 = vpop.permute.xlu0 %901  ;;  %v906_v40 = vpop.permute.xlu1 %905 }
 0x325   :  { %1905 = vmatmul.mubr.f32.gmra.mrb[20].mxu1 %v853_v52 }
 0x326   :  { %1907 = vmatprep.mubr.f32.mxu1 %v854_v53 }
 0x327   :  { %1158 = vperm.xlu1 %2232, %v2395_v32   ;;  %v910_v37 = vpop.permute.xlu0 %909  ;;  %v914_v53 = vpop.permute.xlu1 %913 }
 0x329   :  { %1908 = vmatmul.mubr.f32.gmra.mrb[22].mxu1 %v855_v54 }
 0x32a   :  { %1910 = vmatprep.mubr.f32.mxu1 %v856_v55 }
 0x32b   :  { %1166 = vperm.xlu1 %2232, %v2403_v35   ;;  %v918_v50 = vpop.permute.xlu0 %917 }
 0x32d   :  { %1911 = vmatmul.mubr.f32.gmra.mrb[24].mxu1 %v857_v56 }
 0x32e   :  { %1913 = vmatprep.mubr.f32.mxu1 %v858_v57 }
 0x331   :  { %1914 = vmatmul.mubr.f32.gmra.mrb[26].mxu1 %v859_v58 }
 0x332   :  { %1916 = vmatprep.mubr.f32.mxu1 %v860_v59 }
 0x335   :  { %1917 = vmatmul.mubr.f32.gmra.mrb[28].mxu1 %v861_v60 }
 0x336   :  { %1919 = vmatprep.mubr.f32.mxu1 %v862_v61 }
 0x339   :  { %1920 = vmatmul.mubr.f32.gmra.mrb[30].mxu1 %v863_v62  ;;  %v926_v62 = vpop.permute.xlu0 %925 }
 0x3f0   :  { %v1900_v18 = vpop.f32.mrb[16].mxu1 }
 0x3f1   :  { %v1000_v20 = vadd.f32 %v1900_v18, %v870_v8  ;;  %v994_v22 = vpop.f32.mrb[17].mxu1 }
 0x3f2   :  { %v995_v24 = vadd.f32 %v994_v22, %v866_v7  ;;  %v922_v7 = vpop.permute.xlu1 %921  ;;  %v1090_v22 = vld [vmem:[#allocation2 + $0x208] sm:$0xff] }
 0x3f3   :  { %v1074_v26 = vmax.f32 %v1000_v20, 0.0 }
 0x3f4   :  { %v1073_v1 = vmax.f32 %v995_v24, 0.0  ;;  %v1903_v28 = vpop.f32.mrb[18].mxu1  ;;  %v1091_v24 = vld [vmem:[#allocation2 + $0x210] sm:$0xff] }
 0x3f5   :  { %v1010_v34 = vadd.f32 %v1903_v28, %v878_v10  ;;  %v1004_v3 = vpop.f32.mrb[19].mxu1  ;;  %v1095_v28 = vld [vmem:[#allocation2 + $0x230] sm:$0xff] }
 0x3f6   :  { %v2134_v32 = vpack.c.bf16 %v1074_v26, %v1073_v1  ;;  %v1005_v4 = vadd.f32 %v1004_v3, %v874_v12  ;;  %v1092_v26 = vld [vmem:[#allocation2 + $0x218] sm:$0xff]  ;;  %v1094_v1 = vld [vmem:[#allocation2 + $0x228] sm:$0xff] }
 0x3f7   :  { %v1076_v35 = vmax.f32 %v1010_v34, 0.0  ;;  %v1097_v34 = vld [vmem:[#allocation2 + $0x240] sm:$0xff]  ;;  %v1098_v3 = vld [vmem:[#allocation2 + $0x248] sm:$0xff] }
 0x3f8   :  { %v1075_v5 = vmax.f32 %v1005_v4, 0.0  ;;  %v1906_v6 = vpop.f32.mrb[20].mxu1  ;;  %2135 = vmatprep.subr.bf16.mxu0 %v2134_v32  ;;  %v1100_v4 = vld [vmem:[#allocation2 + $0x258] sm:$0xff] }
 0x3f9   :  { %v1020_v9 = vadd.f32 %v1906_v6, %v886_v14  ;;  %v1014_v11 = vpop.f32.mrb[21].mxu1  ;;  %2137 = vmatpush3.bf16.msra.mxu0 %v2134_v32  ;;  %v1099_v32 = vld [vmem:[#allocation2 + $0x250] sm:$0xff] }
 0x3fa   :  { %v2138_v15 = vpack.c.bf16 %v1076_v35, %v1075_v5  ;;  %v1015_v17 = vadd.f32 %v1014_v11, %v882_v16  ;;  %v1101_v35 = vld [vmem:[#allocation2 + $0x260] sm:$0xff]  ;;  %v1102_v5 = vld [vmem:[#allocation2 + $0x268] sm:$0xff]  ;;  %v1103_v6 = vld [vmem:[#allocation2 + $0x270] sm:$0xff] }
 0x3fb   :  { %v1078_v21 = vmax.f32 %v1020_v9, 0.0  ;;  %v1104_v9 = vld [vmem:[#allocation2 + $0x278] sm:$0xff]  ;;  %v1336_v11 = vld [vmem:[#allocation2 + $0x2b0] sm:$0xff] }
 0x3fc   :  { %v1077_v23 = vmax.f32 %v1015_v17, 0.0  ;;  %v1909_v25 = vpop.f32.mrb[22].mxu1  ;;  %2139 = vmatprep.subr.bf16.mxu0 %v2138_v15  ;;  %2019 = vmatprep.mubr.f32.mxu1 %v1336_v11  ;;  %v2235_v17 = vld [vmem:[#allocation4] sm:$0xff] }
 0x3fd   :  { %v1030_v27 = vadd.f32 %v1909_v25, %v894_v30  ;;  %v1024_v29 = vpop.f32.mrb[23].mxu1  ;;  %2141 = vmatpush3.bf16.msra.mxu0 %v2138_v15  ;;  %v1093_v30 = vld [vmem:[#allocation2 + $0x220] sm:$0xff]  ;;  %v2293_v15 = vmov 5   ;;  %v1111_v25 = vpop.permute.xlu0 %1110 }
 0x3fe   :  { %v2142_v31 = vpack.c.bf16 %v1078_v21, %v1077_v23  ;;  %v1025_v33 = vadd.f32 %v1024_v29, %v890_v2  ;;  %v1096_v2 = vld [vmem:[#allocation2 + $0x238] sm:$0xff]  ;;  %2234 = vset.pattern.permute.xlu0 %v2293_v15 }
 0x3ff   :  { %v1080_v36 = vmax.f32 %v1030_v27, 0.0  ;;  %1347 = vperm.xlu0 %2234, %v2235_v17  }
 0x400   :  { %v1079_v38 = vmax.f32 %v1025_v33, 0.0  ;;  %v1912_v39 = vpop.f32.mrb[24].mxu1  ;;  %2143 = vmatprep.subr.bf16.mxu0 %v2142_v31 }
 0x401   :  { %v1040_v41 = vadd.f32 %v1912_v39, %v902_v13  ;;  %v1034_v42 = vpop.f32.mrb[25].mxu1  ;;  %2145 = vmatpush3.bf16.msra.mxu0 %v2142_v31  ;;  %v1330_v13 = vld [vmem:[#allocation2 + $0x280] sm:$0xff]  ;;  %v1123_v29 = vpop.permute.xlu0 %1122 }
 0x402   :  { %v2146_v43 = vpack.c.bf16 %v1080_v36, %v1079_v38  ;;  %v1035_v44 = vadd.f32 %v1034_v42, %v898_v19  ;;  %v1107_v19 = vpop.permute.xlu1 %1106 }
 0x403   :  { %v1082_v45 = vmax.f32 %v1040_v41, 0.0 }
 0x404   :  { %v1081_v46 = vmax.f32 %v1035_v44, 0.0  ;;  %v1915_v47 = vpop.f32.mrb[26].mxu1  ;;  %2147 = vmatprep.subr.bf16.mxu0 %v2146_v43 }
 0x405   :  { %v1050_v48 = vadd.f32 %v1915_v47, %v910_v37  ;;  %v1044_v49 = vpop.f32.mrb[27].mxu1  ;;  %2149 = vmatpush3.bf16.msra.mxu0 %v2146_v43  ;;  %v1131_v42 = vpop.permute.xlu0 %1130 }
 0x406   :  { %v2150_v51 = vpack.c.bf16 %v1082_v45, %v1081_v46  ;;  %v1045_v52 = vadd.f32 %v1044_v49, %v906_v40  ;;  %v1115_v21 = vpop.permute.xlu1 %1114 }
 0x407   :  { %v1084_v54 = vmax.f32 %v1050_v48, 0.0 }
 0x408   :  { %v1083_v55 = vmax.f32 %v1045_v52, 0.0  ;;  %v1918_v56 = vpop.f32.mrb[28].mxu1  ;;  %2151 = vmatprep.subr.bf16.mxu0 %v2150_v51 }
 0x409   :  { %v1060_v57 = vadd.f32 %v1918_v56, %v918_v50  ;;  %v1054_v58 = vpop.f32.mrb[29].mxu1  ;;  %2153 = vmatpush3.bf16.msra.mxu0 %v2150_v51 }
 0x40a   :  { %v2154_v59 = vpack.c.bf16 %v1084_v54, %v1083_v55  ;;  %v1055_v60 = vadd.f32 %v1054_v58, %v914_v53  ;;  %v1119_v23 = vpop.permute.xlu1 %1118  ;;  %v1139_v55 = vpop.permute.xlu0 %1138 }
 0x40b   :  { %v1086_v61 = vmax.f32 %v1060_v57, 0.0 }
 0x40c   :  { %v1085_v63 = vmax.f32 %v1055_v60, 0.0  ;;  %v1921_v0 = vpop.f32.mrb[30].mxu1  ;;  %2155 = vmatprep.subr.bf16.mxu0 %v2154_v59 }
 0x40d   :  { %v1070_v8 = vadd.f32 %v1921_v0, %v926_v62  ;;  %v1064_v10 = vpop.f32.mrb[31].mxu1  ;;  %2157 = vmatpush3.bf16.msra.mxu0 %v2154_v59 }
 0x40e   :  { %v2158_v12 = vpack.c.bf16 %v1086_v61, %v1085_v63  ;;  %v1065_v14 = vadd.f32 %v1064_v10, %v922_v7  ;;  %v1127_v27 = vpop.permute.xlu1 %1126  ;;  %v1147_v10 = vpop.permute.xlu0 %1146 }
 0x40f   :  { %v1088_v16 = vmax.f32 %v1070_v8, 0.0 }
 0x410   :  { %v1087_v18 = vmax.f32 %v1065_v14, 0.0  ;;  %2159 = vmatprep.subr.bf16.mxu0 %v2158_v12 }
 0x411   :  { %2161 = vmatpush3.bf16.msra.mxu0 %v2158_v12 }
 0x412   :  { %v2162_v20 = vpack.c.bf16 %v1088_v16, %v1087_v18  ;;  %v1135_v39 = vpop.permute.xlu1 %1134 }
 0x414   :  { %2163 = vmatprep.subr.bf16.mxu0 %v2162_v20 }
 0x415   :  { %2165 = vmatpush3.bf16.msra.mxu0 %v2162_v20 }
 0x416   :  { %v1143_v52 = vpop.permute.xlu1 %1142 }
 0x418   :  { %1955 = vmatmul.mubr.f32.vlgmr.msra.gmra.mrb[32].mxu0 %v1090_v22 }
 0x419   :  { %1957 = vmatprep.mubr.f32.mxu0 %v1091_v24 }
 0x41a   :  { %v1151_v0 = vpop.permute.xlu1 %1150 }
 0x41c   :  { %1958 = vmatmul.mubr.f32.gmra.mrb[34].mxu0 %v1092_v26 }
 0x41d   :  { %1960 = vmatprep.mubr.f32.mxu0 %v1093_v30 }
 0x420   :  { %1961 = vmatmul.mubr.f32.gmra.mrb[36].mxu0 %v1094_v1  ;;  %v1159_v1 = vpop.permute.xlu1 %1158 }
 0x421   :  { %1963 = vmatprep.mubr.f32.mxu0 %v1095_v28 }
 0x424   :  { %1964 = vmatmul.mubr.f32.gmra.mrb[38].mxu0 %v1096_v2 }
 0x425   :  { %1966 = vmatprep.mubr.f32.mxu0 %v1097_v34  ;;  %v1155_v34 = vpop.permute.xlu0 %1154 }
 0x428   :  { %1967 = vmatmul.mubr.f32.gmra.mrb[40].mxu0 %v1098_v3 }
 0x429   :  { %1969 = vmatprep.mubr.f32.mxu0 %v1099_v32 }
 0x42c   :  { %1970 = vmatmul.mubr.f32.gmra.mrb[42].mxu0 %v1100_v4 }
 0x42d   :  { %1972 = vmatprep.mubr.f32.mxu0 %v1101_v35 }
 0x430   :  { %1973 = vmatmul.mubr.f32.gmra.mrb[44].mxu0 %v1102_v5 }
 0x431   :  { %1975 = vmatprep.mubr.f32.mxu0 %v1103_v6 }
 0x434   :  { %1976 = vmatmul.mubr.f32.gmra.mrb[46].mxu0 %v1104_v9 }
 0x435   :  { %2010 = vmatprep.mubr.f32.mxu0 %v1330_v13  ;;  %v1167_v13 = vpop.permute.xlu1 %1166 }
 0x4eb   :  { %v1956_v31 = vpop.f32.mrb[32].mxu0 }
 0x4ec   :  { %v1241_v33 = vadd.f32 %v1956_v31, %v1111_v25  ;;  %v1235_v36 = vpop.f32.mrb[33].mxu0 }
 0x4ed   :  { %v1236_v37 = vadd.f32 %v1235_v36, %v1107_v19  ;;  %v1163_v19 = vpop.permute.xlu0 %1162  ;;  %v1337_v36 = vld [vmem:[#allocation2 + $0x2b8] sm:$0xff] }
 0x4ee   :  { %v1315_v38 = vmax.f32 %v1241_v33, 0.0 }
 0x4ef   :  { %v1314_v40 = vmax.f32 %v1236_v37, 0.0  ;;  %v1959_v41 = vpop.f32.mrb[34].mxu0  ;;  %v1331_v37 = vld [vmem:[#allocation2 + $0x288] sm:$0xff] }
 0x4f0   :  { %v1251_v43 = vadd.f32 %v1959_v41, %v1119_v23  ;;  %v1245_v44 = vpop.f32.mrb[35].mxu0  ;;  %v1333_v41 = vld [vmem:[#allocation2 + $0x298] sm:$0xff] }
 0x4f1   :  { %v2166_v45 = vpack.c.bf16 %v1315_v38, %v1314_v40  ;;  %v1246_v46 = vadd.f32 %v1245_v44, %v1115_v21  ;;  %v1338_v38 = vld [vmem:[#allocation2 + $0x2c0] sm:$0xff]  ;;  %v1339_v40 = vld [vmem:[#allocation2 + $0x2c8] sm:$0xff]  ;;  %v1341_v44 = vld [vmem:[#allocation2 + $0x2d8] sm:$0xff] }
 0x4f2   :  { %v1317_v47 = vmax.f32 %v1251_v43, 0.0  ;;  %v1334_v43 = vld [vmem:[#allocation2 + $0x2a0] sm:$0xff] }
 0x4f3   :  { %v1316_v48 = vmax.f32 %v1246_v46, 0.0  ;;  %v1962_v49 = vpop.f32.mrb[36].mxu0  ;;  %2167 = vmatprep.subr.bf16.mxu0 %v2166_v45  ;;  %2198 = vmatprep.subr.bf16.mxu1 %v2166_v45  ;;  %v1342_v46 = vld [vmem:[#allocation2 + $0x2e0] sm:$0xff] }
 0x4f4   :  { %v1261_v50 = vadd.f32 %v1962_v49, %v1127_v27  ;;  %v1255_v51 = vpop.f32.mrb[37].mxu0  ;;  %2169 = vmatpush3.bf16.msra.mxu0 %v2166_v45  ;;  %2206 = vmatpush3.bf16.msra.mxu1 %v2166_v45  ;;  %v1335_v45 = vld [vmem:[#allocation2 + $0x2a8] sm:$0xff]  ;;  %v1345_v49 = vld [vmem:[#allocation2 + $0x2f8] sm:$0xff] }
 0x4f5   :  { %v2170_v53 = vpack.c.bf16 %v1317_v47, %v1316_v48  ;;  %v1256_v54 = vadd.f32 %v1255_v51, %v1123_v29  ;;  %v1343_v47 = vld [vmem:[#allocation2 + $0x2e8] sm:$0xff]  ;;  %v1344_v48 = vld [vmem:[#allocation2 + $0x2f0] sm:$0xff] }
 0x4f6   :  { %v1319_v56 = vmax.f32 %v1261_v50, 0.0  ;;  %v1348_v50 = vpop.permute.xlu0 %1347 }
 0x4f7   :  { %v1318_v57 = vmax.f32 %v1256_v54, 0.0  ;;  %v1965_v58 = vpop.f32.mrb[38].mxu0  ;;  %2171 = vmatprep.subr.bf16.mxu0 %v2170_v53  ;;  %2199 = vmatprep.subr.bf16.mxu1 %v2170_v53 }
 0x4f8   :  { %v1271_v59 = vadd.f32 %v1965_v58, %v1135_v39  ;;  %v1265_v60 = vpop.f32.mrb[39].mxu0  ;;  %2173 = vmatpush3.bf16.msra.mxu0 %v2170_v53  ;;  %2207 = vmatpush3.bf16.msra.mxu1 %v2170_v53  ;;  %v1332_v39 = vld [vmem:[#allocation2 + $0x290] sm:$0xff] }
 0x4f9   :  { %v2174_v61 = vpack.c.bf16 %v1319_v56, %v1318_v57  ;;  %v1266_v62 = vadd.f32 %v1265_v60, %v1131_v42  ;;  %v1340_v42 = vld [vmem:[#allocation2 + $0x2d0] sm:$0xff] }
 0x4fa   :  { %v1321_v63 = vmax.f32 %v1271_v59, 0.0 }
 0x4fb   :  { %v1320_v7 = vmax.f32 %v1266_v62, 0.0  ;;  %v1968_v8 = vpop.f32.mrb[40].mxu0  ;;  %2175 = vmatprep.subr.bf16.mxu0 %v2174_v61  ;;  %2200 = vmatprep.subr.bf16.mxu1 %v2174_v61 }
 0x4fc   :  { %v1281_v12 = vadd.f32 %v1968_v8, %v1143_v52  ;;  %v1275_v14 = vpop.f32.mrb[41].mxu0  ;;  %2177 = vmatpush3.bf16.msra.mxu0 %v2174_v61  ;;  %2208 = vmatpush3.bf16.msra.mxu1 %v2174_v61 }
 0x4fd   :  { %v2178_v16 = vpack.c.bf16 %v1321_v63, %v1320_v7  ;;  %v1276_v18 = vadd.f32 %v1275_v14, %v1139_v55 }
 0x4fe   :  { %v1323_v20 = vmax.f32 %v1281_v12, 0.0 }
 0x4ff   :  { %v1322_v22 = vmax.f32 %v1276_v18, 0.0  ;;  %v1971_v24 = vpop.f32.mrb[42].mxu0  ;;  %2179 = vmatprep.subr.bf16.mxu0 %v2178_v16  ;;  %2201 = vmatprep.subr.bf16.mxu1 %v2178_v16 }
 0x500   :  { %v1291_v26 = vadd.f32 %v1971_v24, %v1151_v0  ;;  %v1285_v30 = vpop.f32.mrb[43].mxu0  ;;  %2181 = vmatpush3.bf16.msra.mxu0 %v2178_v16  ;;  %2209 = vmatpush3.bf16.msra.mxu1 %v2178_v16 }
 0x501   :  { %v2182_v28 = vpack.c.bf16 %v1323_v20, %v1322_v22  ;;  %v1286_v2 = vadd.f32 %v1285_v30, %v1147_v10 }
 0x502   :  { %v1325_v3 = vmax.f32 %v1291_v26, 0.0 }
 0x503   :  { %v1324_v32 = vmax.f32 %v1286_v2, 0.0  ;;  %v1974_v4 = vpop.f32.mrb[44].mxu0  ;;  %2183 = vmatprep.subr.bf16.mxu0 %v2182_v28  ;;  %2202 = vmatprep.subr.bf16.mxu1 %v2182_v28 }
 0x504   :  { %v1301_v35 = vadd.f32 %v1974_v4, %v1159_v1  ;;  %v1295_v5 = vpop.f32.mrb[45].mxu0  ;;  %2185 = vmatpush3.bf16.msra.mxu0 %v2182_v28  ;;  %2210 = vmatpush3.bf16.msra.mxu1 %v2182_v28 }
 0x505   :  { %v2186_v6 = vpack.c.bf16 %v1325_v3, %v1324_v32  ;;  %v1296_v9 = vadd.f32 %v1295_v5, %v1155_v34 }
 0x506   :  { %v1327_v11 = vmax.f32 %v1301_v35, 0.0 }
 0x507   :  { %v1326_v15 = vmax.f32 %v1296_v9, 0.0  ;;  %v1977_v17 = vpop.f32.mrb[46].mxu0  ;;  %2187 = vmatprep.subr.bf16.mxu0 %v2186_v6  ;;  %2203 = vmatprep.subr.bf16.mxu1 %v2186_v6 }
 0x508   :  { %v1311_v21 = vadd.f32 %v1977_v17, %v1167_v13  ;;  %v1305_v23 = vpop.f32.mrb[47].mxu0  ;;  %2189 = vmatpush3.bf16.msra.mxu0 %v2186_v6  ;;  %2211 = vmatpush3.bf16.msra.mxu1 %v2186_v6 }
 0x509   :  { %v2190_v25 = vpack.c.bf16 %v1327_v11, %v1326_v15  ;;  %v1306_v27 = vadd.f32 %v1305_v23, %v1163_v19 }
 0x50a   :  { %v1329_v29 = vmax.f32 %v1311_v21, 0.0 }
 0x50b   :  { %v1328_v31 = vmax.f32 %v1306_v27, 0.0  ;;  %2191 = vmatprep.subr.bf16.mxu0 %v2190_v25  ;;  %2204 = vmatprep.subr.bf16.mxu1 %v2190_v25 }
 0x50c   :  { %2193 = vmatpush3.bf16.msra.mxu0 %v2190_v25  ;;  %2212 = vmatpush3.bf16.msra.mxu1 %v2190_v25 }
 0x50d   :  { %v2194_v33 = vpack.c.bf16 %v1329_v29, %v1328_v31 }
 0x50f   :  { %2195 = vmatprep.subr.bf16.mxu0 %v2194_v33  ;;  %2205 = vmatprep.subr.bf16.mxu1 %v2194_v33 }
 0x510   :  { %2197 = vmatpush3.bf16.msra.mxu0 %v2194_v33  ;;  %2213 = vmatpush3.bf16.msra.mxu1 %v2194_v33 }
 0x513   :  { %2020 = vmatmul.mubr.f32.vlgmr.msra.gmra.mrb[32].mxu1 %v1337_v36  ;;  %2011 = vmatmul.mubr.f32.vlgmr.msra.gmra.mrb[48].mxu0 %v1331_v37 }
 0x514   :  { %2022 = vmatprep.mubr.f32.mxu1 %v1338_v38  ;;  %2013 = vmatprep.mubr.f32.mxu0 %v1332_v39 }
 0x517   :  { %2023 = vmatmul.mubr.f32.gmra.mrb[34].mxu1 %v1339_v40  ;;  %2014 = vmatmul.mubr.f32.gmra.mrb[50].mxu0 %v1333_v41 }
 0x518   :  { %2025 = vmatprep.mubr.f32.mxu1 %v1340_v42  ;;  %2016 = vmatprep.mubr.f32.mxu0 %v1334_v43 }
 0x51b   :  { %2026 = vmatmul.mubr.f32.gmra.mrb[36].mxu1 %v1341_v44  ;;  %2017 = vmatmul.mubr.f32.gmra.mrb[52].mxu0 %v1335_v45 }
 0x51c   :  { %2028 = vmatprep.mubr.f32.mxu1 %v1342_v46 }
 0x51f   :  { %2029 = vmatmul.mubr.f32.gmra.mrb[38].mxu1 %v1343_v47 }
 0x520   :  { %2031 = vmatprep.mubr.f32.mxu1 %v1344_v48 }
 0x523   :  { %2032 = vmatmul.mubr.f32.gmra.mrb[40].mxu1 %v1345_v49 }
 0x5e6   :  { %v2021_v51 = vpop.f32.mrb[32].mxu1  ;;  %v2012_v52 = vpop.f32.mrb[48].mxu0 }
 0x5e7   :  { %v1486_v53 = vpop.f32.mrb[33].mxu1  ;;  %v1461_v54 = vpop.f32.mrb[49].mxu0 }
 0x5e8   :  { %v1462_v55 = vadd.f32 %v1461_v54, %v1348_v50 }
 0x5ea   :  { %v2024_v56 = vpop.f32.mrb[34].mxu1  ;;  %1525 = vst [vmem:[%s2478_s3] sm:$0x1] %v1462_v55  ;;  %v2015_v57 = vpop.f32.mrb[50].mxu0 }
 0x5eb   :  { %v1494_v58 = vpop.f32.mrb[35].mxu1  ;;  %v1470_v59 = vpop.f32.mrb[51].mxu0 }
 0x5ee   :  { %v2027_v60 = vpop.f32.mrb[36].mxu1  ;;  %v2018_v61 = vpop.f32.mrb[52].mxu0 }
 0x5ef   :  { %v1502_v62 = vpop.f32.mrb[37].mxu1  ;;  %v1478_v63 = vpop.f32.mrb[53].mxu0 }
 0x5f2   :  { %v2030_v0 = vpop.f32.mrb[38].mxu1 }
 0x5f3   :  { %v1510_v7 = vpop.f32.mrb[39].mxu1 }
 0x5f6   :  { %v2033_v8 = vpop.f32.mrb[40].mxu1 }
 0x5f7   :  { %v1518_v10 = vpop.f32.mrb[41].mxu1 }
 0x5f8   :  { %1530 = vsyncpa [#allocation3], 1 }
 0x5f9   :  { %1531 = vsyncpa [#allocation5], 1 }

</bundles_post_ra>
